<compile_context>
chip_gen: v7x
topology: tpu7x:2x2x1
jax: 0.10.0
libtpu: 0.0.40
codegen_flags: <defaults>
</compile_context>

<pallas_src>
import functools

import numpy as np
import jax
import jax.numpy as jnp
from jax.experimental import pallas as pl
from jax.experimental.pallas import tpu as pltpu

_LANE = 128


def make_gaussian_kernel2d(kernel=3, std=1.0):
    """2D Gaussian filter taps; mirrors the PyTorch helper (float32)."""
    n = np.arange(kernel, dtype=np.float32) - (kernel - 1.0) / 2.0
    g1 = np.exp(-(n ** 2) / np.float32(2.0 * std * std))
    g2 = np.outer(g1, g1)
    return (g2 / g2.sum()).astype(np.float32)


def _blurpool_kernel(x_ref, o_ref, *, weights, ksize, stride, out_h, out_w):
    """Depthwise KxK stencil on a channels-last block.

    x_ref: (H_pad, W_pad, TILE_NC)   o_ref: (H_out, W_out, TILE_NC)
    o[i, j, c] = sum_{di,dj} w[di,dj] * x[i*stride + di, j*stride + dj, c]
    """
    acc = None
    for di in range(ksize):                      # static unroll: K*K taps
        for dj in range(ksize):
            if stride == 1:
                win = x_ref[di:di + out_h, dj:dj + out_w, :]
            else:
                # Strided addressed loads; the lane (NC) dim stays contiguous.
                win = x_ref[pl.ds(di, out_h, stride=stride),
                            pl.ds(dj, out_w, stride=stride), :]
            term = win.astype(jnp.float32) * np.float32(weights[di][dj])
            acc = term if acc is None else acc + term
    o_ref[...] = acc.astype(o_ref.dtype)


def _plan_tiles(nc, hp, wp, ho, wo, itemsize):
    """Pick (nc_tile, padded_nc, vmem_limit_bytes) per TPU generation."""
    try:
        vmem_bytes = int(pltpu.get_tpu_info().vmem_capacity_bytes)
    except Exception:
        vmem_bytes = 64 << 20                     # v7x-safe fallback
    vmem_limit = min((3 * vmem_bytes) // 4, 100 << 20)
    step_budget = vmem_limit // 4                 # double-buffered in+out + scratch

    # Bytes per NC lane of one grid step: pipelined input+output blocks (each
    # double-buffered, input dtype) + f32 accumulator + one f32 tap temporary.
    per_nc = 2 * itemsize * (hp * wp + ho * wo) + 2 * 4 * ho * wo

    if nc <= _LANE:
        # Last block dim == full array extent satisfies the (8,128) rule.
        return nc, nc, vmem_limit

    nc_pad = -(-nc // _LANE) * _LANE
    max_by_budget = max(1, step_budget // max(1, per_nc * _LANE))
    # Keep >= 2 grid steps so DMA/compute overlap is active (and v7x can shard
    # the "parallel" axis across its 2 TensorCores).
    max_by_grid = max(1, (nc_pad // _LANE + 1) // 2)
    mult = max(1, min(max_by_budget, max_by_grid))
    tile = mult * _LANE
    n_steps = -(-nc_pad // tile)
    # v7x megacore: prefer an even step count when the padded waste is small.
    if n_steps > 1 and n_steps % 2 == 1 and n_steps >= 7:
        n_steps += 1
    return tile, n_steps * tile, vmem_limit


def custom_blur_pool(x, kernel_size=3, stride=1, padding=0, std=1.0):
    """Forward of CustomBlurPool: reflect-pad + strided depthwise Gaussian conv."""
    n, c, h, w = (int(d) for d in x.shape)
    k, s, p = int(kernel_size), int(stride), int(padding)
    hp, wp = h + 2 * p, w + 2 * p
    ho = (hp - k) // s + 1
    wo = (wp - k) // s + 1
    nc = n * c

    # Channels-last: (H, W, N*C) with N*C on the 128-lane axis.  XLA fuses the
    # reflect pad (and NC zero-pad) into this single layout-change pass.
    xt = jnp.transpose(x.reshape(nc, h, w), (1, 2, 0))
    if p > 0:
        xt = jnp.pad(xt, ((p, p), (p, p), (0, 0)), mode="reflect")

    tile_nc, nc_pad, vmem_limit = _plan_tiles(nc, hp, wp, ho, wo,
                                              x.dtype.itemsize)
    if nc_pad != nc:
        xt = jnp.pad(xt, ((0, 0), (0, 0), (0, nc_pad - nc)))

    taps = make_gaussian_kernel2d(k, std)
    weights = tuple(tuple(float(v) for v in row) for row in taps)
    kernel = functools.partial(_blurpool_kernel, weights=weights, ksize=k,
                               stride=s, out_h=ho, out_w=wo)

    grid = (nc_pad // tile_nc,)
    # TODO(synk): add row-tiled BlockSpecs with a (K-1)-row halo so a full
    # 128-lane tile still double-buffers inside v7x's 64 MiB VMEM for very
    # large spatial extents (currently each block holds the whole padded plane).
    out = pl.pallas_call(
        kernel,
        out_shape=jax.ShapeDtypeStruct((ho, wo, nc_pad), x.dtype),
        grid=grid,
        in_specs=[pl.BlockSpec((hp, wp, tile_nc), lambda i: (0, 0, i))],
        out_specs=pl.BlockSpec((ho, wo, tile_nc), lambda i: (0, 0, i)),
        compiler_params=pltpu.CompilerParams(
            dimension_semantics=("parallel",),
            vmem_limit_bytes=int(vmem_limit)),
        cost_estimate=pl.CostEstimate(
            flops=2 * k * k * ho * wo * nc_pad,
            transcendentals=0,
            bytes_accessed=x.dtype.itemsize * nc_pad * (hp * wp + ho * wo)),
    )(xt)

    out = out[:, :, :nc]
    return jnp.transpose(out, (2, 0, 1)).reshape(n, c, ho, wo)


def _reference(x, kernel_size, stride, padding, std=1.0):
    """Independent reference: depthwise conv via lax (== F.conv2d(groups=C))."""
    _, c, _, _ = x.shape
    taps = jnp.asarray(make_gaussian_kernel2d(kernel_size, std))
    filt = jnp.broadcast_to(taps[None, None, :, :],
                            (c, 1, kernel_size, kernel_size))
    xp = x.astype(jnp.float32)
    if padding > 0:
        xp = jnp.pad(xp, ((0, 0), (0, 0), (padding, padding),
                          (padding, padding)), mode="reflect")
    return jax.lax.conv_general_dilated(
        xp, filt, window_strides=(stride, stride), padding="VALID",
        dimension_numbers=("NCHW", "OIHW", "NCHW"), feature_group_count=c)


if __name__ == "__main__":
    key = jax.random.PRNGKey(0)
    k1, k2 = jax.random.split(key)

    # Case 1: spec-sized f32 input (N=2, C=4, 16x16, K=3, stride=1, pad=1).
    x = jax.random.normal(k1, (2, 4, 16, 16), dtype=jnp.float32)
    out = jax.block_until_ready(custom_blur_pool(x, kernel_size=3, stride=1,
                                                 padding=1))
    ref = _reference(x, 3, 1, 1)
    assert out.shape == ref.shape and out.dtype == x.dtype
    assert jnp.allclose(out, ref, atol=1e-5, rtol=1e-5), \
        float(jnp.max(jnp.abs(out - ref)))

    # Case 2: bf16 input (f32 accumulation in-kernel, bf16 store).
    xb = x.astype(jnp.bfloat16)
    outb = jax.block_until_ready(custom_blur_pool(xb, kernel_size=3, stride=1,
                                                  padding=1))
    refb = _reference(xb, 3, 1, 1)
    assert outb.dtype == jnp.bfloat16
    assert jnp.allclose(outb.astype(jnp.float32), refb, atol=3e-2, rtol=3e-2), \
        float(jnp.max(jnp.abs(outb.astype(jnp.float32) - refb)))

    # Case 3: NC > 128 and not a multiple of 128 -> exercises the lane-tile
    # NC zero-padding path and a 2-step "parallel" grid.
    x3 = jax.random.normal(k2, (2, 80, 12, 12), dtype=jnp.float32)
    out3 = jax.block_until_ready(custom_blur_pool(x3, kernel_size=3, stride=1,
                                                  padding=1))
    ref3 = _reference(x3, 3, 1, 1)
    assert out3.shape == ref3.shape
    assert jnp.allclose(out3, ref3, atol=1e-5, rtol=1e-5), \
        float(jnp.max(jnp.abs(out3 - ref3)))

    print("KERNEL_OK")
</pallas_src>

<mosaic_0001>
module attributes {stable_mosaic.version = 11 : i64} {
  func.func @_blurpool_kernel(%arg0: i32, %arg1: memref<18x18x8xf32, #tpu.memory_space<vmem>>, %arg2: memref<16x16x8xf32, #tpu.memory_space<vmem>>) attributes {dimension_semantics = [#tpu.dimension_semantics<parallel>], iteration_bounds = array<i64: 1>, scalar_prefetch = 0 : i64, scratch_operands = 0 : i64, tpu.core_type = #tpu.core_type<tc>, window_params = [{transform_indices = @transform_0, window_bounds = array<i64: 18, 18, 8>}, {transform_indices = @transform_1, window_bounds = array<i64: 16, 16, 8>}]} {
    %c0 = arith.constant 0 : index
    %c0_0 = arith.constant 0 : index
    %c0_1 = arith.constant 0 : index
    %0 = vector.load %arg1[%c0, %c0_0, %c0_1] : memref<18x18x8xf32, #tpu.memory_space<vmem>>, vector<16x16x8xf32>
    %cst = arith.constant 0.0751136094 : f32
    %1 = vector.broadcast %cst : f32 to vector<16x16x8xf32>
    %2 = arith.mulf %0, %1 : vector<16x16x8xf32>
    %c0_2 = arith.constant 0 : index
    %c1 = arith.constant 1 : index
    %c0_3 = arith.constant 0 : index
    %3 = vector.load %arg1[%c0_2, %c1, %c0_3] : memref<18x18x8xf32, #tpu.memory_space<vmem>>, vector<16x16x8xf32>
    %cst_4 = arith.constant 0.123841412 : f32
    %4 = vector.broadcast %cst_4 : f32 to vector<16x16x8xf32>
    %5 = arith.mulf %3, %4 : vector<16x16x8xf32>
    %6 = arith.addf %2, %5 : vector<16x16x8xf32>
    %c0_5 = arith.constant 0 : index
    %c2 = arith.constant 2 : index
    %c0_6 = arith.constant 0 : index
    %7 = vector.load %arg1[%c0_5, %c2, %c0_6] : memref<18x18x8xf32, #tpu.memory_space<vmem>>, vector<16x16x8xf32>
    %cst_7 = arith.constant 0.0751136094 : f32
    %8 = vector.broadcast %cst_7 : f32 to vector<16x16x8xf32>
    %9 = arith.mulf %7, %8 : vector<16x16x8xf32>
    %10 = arith.addf %6, %9 : vector<16x16x8xf32>
    %c1_8 = arith.constant 1 : index
    %c0_9 = arith.constant 0 : index
    %c0_10 = arith.constant 0 : index
    %11 = vector.load %arg1[%c1_8, %c0_9, %c0_10] : memref<18x18x8xf32, #tpu.memory_space<vmem>>, vector<16x16x8xf32>
    %cst_11 = arith.constant 0.123841412 : f32
    %12 = vector.broadcast %cst_11 : f32 to vector<16x16x8xf32>
    %13 = arith.mulf %11, %12 : vector<16x16x8xf32>
    %14 = arith.addf %10, %13 : vector<16x16x8xf32>
    %c1_12 = arith.constant 1 : index
    %c1_13 = arith.constant 1 : index
    %c0_14 = arith.constant 0 : index
    %15 = vector.load %arg1[%c1_12, %c1_13, %c0_14] : memref<18x18x8xf32, #tpu.memory_space<vmem>>, vector<16x16x8xf32>
    %cst_15 = arith.constant 0.204179958 : f32
    %16 = vector.broadcast %cst_15 : f32 to vector<16x16x8xf32>
    %17 = arith.mulf %15, %16 : vector<16x16x8xf32>
    %18 = arith.addf %14, %17 : vector<16x16x8xf32>
    %c1_16 = arith.constant 1 : index
    %c2_17 = arith.constant 2 : index
    %c0_18 = arith.constant 0 : index
    %19 = vector.load %arg1[%c1_16, %c2_17, %c0_18] : memref<18x18x8xf32, #tpu.memory_space<vmem>>, vector<16x16x8xf32>
    %cst_19 = arith.constant 0.123841412 : f32
    %20 = vector.broadcast %cst_19 : f32 to vector<16x16x8xf32>
    %21 = arith.mulf %19, %20 : vector<16x16x8xf32>
    %22 = arith.addf %18, %21 : vector<16x16x8xf32>
    %c2_20 = arith.constant 2 : index
    %c0_21 = arith.constant 0 : index
    %c0_22 = arith.constant 0 : index
    %23 = vector.load %arg1[%c2_20, %c0_21, %c0_22] : memref<18x18x8xf32, #tpu.memory_space<vmem>>, vector<16x16x8xf32>
    %cst_23 = arith.constant 0.0751136094 : f32
    %24 = vector.broadcast %cst_23 : f32 to vector<16x16x8xf32>
    %25 = arith.mulf %23, %24 : vector<16x16x8xf32>
    %26 = arith.addf %22, %25 : vector<16x16x8xf32>
    %c2_24 = arith.constant 2 : index
    %c1_25 = arith.constant 1 : index
    %c0_26 = arith.constant 0 : index
    %27 = vector.load %arg1[%c2_24, %c1_25, %c0_26] : memref<18x18x8xf32, #tpu.memory_space<vmem>>, vector<16x16x8xf32>
    %cst_27 = arith.constant 0.123841412 : f32
    %28 = vector.broadcast %cst_27 : f32 to vector<16x16x8xf32>
    %29 = arith.mulf %27, %28 : vector<16x16x8xf32>
    %30 = arith.addf %26, %29 : vector<16x16x8xf32>
    %c2_28 = arith.constant 2 : index
    %c2_29 = arith.constant 2 : index
    %c0_30 = arith.constant 0 : index
    %31 = vector.load %arg1[%c2_28, %c2_29, %c0_30] : memref<18x18x8xf32, #tpu.memory_space<vmem>>, vector<16x16x8xf32>
    %cst_31 = arith.constant 0.0751136094 : f32
    %32 = vector.broadcast %cst_31 : f32 to vector<16x16x8xf32>
    %33 = arith.mulf %31, %32 : vector<16x16x8xf32>
    %34 = arith.addf %30, %33 : vector<16x16x8xf32>
    %c0_32 = arith.constant 0 : index
    %c0_33 = arith.constant 0 : index
    %c0_34 = arith.constant 0 : index
    %35 = vector.load %arg2[%c0_32, %c0_33, %c0_34] : memref<16x16x8xf32, #tpu.memory_space<vmem>>, vector<16x16x8xf32>
    tpu.vector_store %arg2[%c0_32, %c0_33, %c0_34], %34 {strides = array<i32>} : memref<16x16x8xf32, #tpu.memory_space<vmem>>, vector<16x16x8xf32>,
    return
  }
  func.func @transform_0(%arg0: i32) -> (i32, i32, i32) {
    %c0_i32 = arith.constant 0 : i32
    %c0_i32_0 = arith.constant 0 : i32
    %c0_i32_1 = arith.constant 0 : i32
    return %c0_i32, %c0_i32_0, %arg0 : i32, i32, i32
  }
  func.func @transform_1(%arg0: i32) -> (i32, i32, i32) {
    %c0_i32 = arith.constant 0 : i32
    %c0_i32_0 = arith.constant 0 : i32
    %c0_i32_1 = arith.constant 0 : i32
    return %c0_i32, %c0_i32_0, %arg0 : i32, i32, i32
  }
}

</mosaic_0001>

<bundles_post_ra>
// kernel: tpu_custom_call.1
= control target key start
LH: loop header
LB: loop body
LE: loop exit
PB: predicated region body
PF: predicated region fallthrough
CT: control target
= control target key end

     0   :  { %vm842_vm0 = vcmask 64512   ;;  %s1533_s0 = inlined_call_operand.vmem [shape: f32[18,18,8], index: 0, kind: input, shape index: {}]   ;;  %s1534_s1 = inlined_call_operand.vmem [shape: f32[16,16,8], index: 1, kind: output, shape index: {}]  }
   0x1   :  { %v8_v0 = vld [vmem:[%s1533_s0] sm:$0xff]  ;;  %v879_v6 = vld [vmem:[%s1533_s0 + $0x18] sm:$0xff]  ;;  %v975_v12 = vld [vmem:[%s1533_s0 + $0x30] sm:$0xff] }
   0x2   :  { %v72_v1 = vld [vmem:[%s1533_s0 + $0x1] sm:$0xff]  ;;  %v40_v3 = vmul.f32 0.07511361, %v8_v0  ;;  %v297_v8 = vmul.f32 0.12384141, %v879_v6  ;;  %v911_v9 = vld [vmem:[%s1533_s0 + $0x19] sm:$0xff] }
   0x3   :  { %v168_v2 = vld [vmem:[%s1533_s0 + $0x2] sm:$0xff]  ;;  %v104_v4 = vmul.f32 0.12384141, %v72_v1  ;;  %v393_v10 = vmul.f32 0.20417996, %v911_v9  ;;  %v943_v11 = vld [vmem:[%s1533_s0 + $0x1a] sm:$0xff] }
   0x4   :  { %v200_v5 = vmul.f32 0.07511361, %v168_v2  ;;  %v42_v13 = vmul.f32 0.07511361, %v879_v6  ;;  %v489_v15 = vmul.f32 0.12384141, %v943_v11 }
   0x5   :  { %v136_v7 = vadd.f32 %v104_v4, %v40_v3  ;;  %v586_v16 = vmul.f32 0.07511361, %v975_v12  ;;  %v1007_v17 = vld [vmem:[%s1533_s0 + $0x31] sm:$0xff]  ;;  %v9_v19 = vld [vmem:[%s1533_s0 + $0x8] sm:$0xff]  ;;  %v106_v22 = vmul.f32 0.12384141, %v911_v9 }
   0x6   :  { %v1039_v18 = vld [vmem:[%s1533_s0 + $0x32] sm:$0xff]  ;;  %v73_v20 = vld [vmem:[%s1533_s0 + $0x9] sm:$0xff]  ;;  %v41_v24 = vmul.f32 0.07511361, %v9_v19  ;;  %v682_v27 = vmul.f32 0.12384141, %v1007_v17 }
   0x7   :  { %v232_v14 = vadd.f32 %v200_v5, %v136_v7  ;;  %v169_v21 = vld [vmem:[%s1533_s0 + $0xa] sm:$0xff]  ;;  %v105_v25 = vmul.f32 0.12384141, %v73_v20  ;;  %v880_v28 = vld [vmem:[%s1533_s0 + $0x20] sm:$0xff]  ;;  %v138_v30 = vadd.f32 %v106_v22, %v42_v13  ;;  %v202_v31 = vmul.f32 0.07511361, %v943_v11 }
   0x8   :  { %v201_v26 = vmul.f32 0.07511361, %v169_v21  ;;  %v912_v29 = vld [vmem:[%s1533_s0 + $0x21] sm:$0xff]  ;;  %v298_v34 = vmul.f32 0.12384141, %v880_v28  ;;  %v976_v36 = vld [vmem:[%s1533_s0 + $0x38] sm:$0xff]  ;;  %v140_v50 = vadd.f32 %v682_v27, %v586_v16 }
   0x9   :  { %v329_v23 = vadd.f32 %v297_v8, %v232_v14  ;;  %v137_v33 = vadd.f32 %v105_v25, %v41_v24  ;;  %v944_v35 = vld [vmem:[%s1533_s0 + $0x22] sm:$0xff]  ;;  %v1008_v37 = vld [vmem:[%s1533_s0 + $0x39] sm:$0xff]  ;;  %v778_v38 = vmul.f32 0.07511361, %v1039_v18  ;;  %v394_v39 = vmul.f32 0.20417996, %v912_v29 }
   0xa   :  { %v490_v40 = vmul.f32 0.12384141, %v944_v35  ;;  %v234_v41 = vadd.f32 %v202_v31, %v138_v30  ;;  %v1040_v44 = vld [vmem:[%s1533_s0 + $0x3a] sm:$0xff]  ;;  %v299_v45 = vmul.f32 0.12384141, %v975_v12  ;;  %v977_v54 = vld [vmem:[%s1533_s0 + $0x48] sm:$0xff] }
   0xb   :  { %v425_v32 = vadd.f32 %v393_v10, %v329_v23  ;;  %v233_v43 = vadd.f32 %v201_v26, %v137_v33  ;;  %v395_v46 = vmul.f32 0.20417996, %v1007_v17  ;;  %v587_v47 = vmul.f32 0.07511361, %v976_v36  ;;  %v1009_v61 = vld [vmem:[%s1533_s0 + $0x49] sm:$0xff]  ;;  %v1010_v19 = vld [vmem:[%s1533_s0 + $0x51] sm:$0xff] }
   0xc   :  { %v683_v48 = vmul.f32 0.12384141, %v1008_v37  ;;  %v491_v49 = vmul.f32 0.12384141, %v1039_v18  ;;  %v331_v53 = vadd.f32 %v299_v45, %v234_v41  ;;  %v43_v55 = vmul.f32 0.07511361, %v880_v28 }
   0xd   :  { %v521_v42 = vadd.f32 %v489_v15, %v425_v32  ;;  %v330_v52 = vadd.f32 %v298_v34, %v233_v43  ;;  %v779_v56 = vmul.f32 0.07511361, %v1040_v44  ;;  %v107_v57 = vmul.f32 0.12384141, %v912_v29  ;;  %v1041_v0 = vld [vmem:[%s1533_s0 + $0x4a] sm:$0xff]  ;;  %v979_v22 = vld [vmem:[%s1533_s0 + $0x60] sm:$0xff] }
   0xe   :  { %v427_v60 = vadd.f32 %v395_v46, %v331_v53  ;;  %v203_v62 = vmul.f32 0.07511361, %v944_v35  ;;  %v588_v63 = vmul.f32 0.07511361, %v977_v54  ;;  %v300_v2 = vmul.f32 0.12384141, %v976_v36 }
   0xf   :  { %v618_v51 = vadd.f32 %v586_v16, %v521_v42  ;;  %v426_v59 = vadd.f32 %v394_v39, %v330_v52  ;;  %v139_v1 = vadd.f32 %v107_v57, %v43_v55  ;;  %v236_v3 = vadd.f32 %v778_v38, %v140_v50  ;;  %v978_v7 = vld [vmem:[%s1533_s0 + $0x50] sm:$0xff]  ;;  %v1011_v30 = vld [vmem:[%s1533_s0 + $0x61] sm:$0xff] }
  0x10   :  { %v523_v6 = vadd.f32 %v491_v49, %v427_v60  ;;  %v141_v8 = vadd.f32 %v683_v48, %v587_v47  ;;  %v684_v9 = vmul.f32 0.12384141, %v1009_v61  ;;  %v396_v11 = vmul.f32 0.20417996, %v1008_v37  ;;  %v1042_v28 = vld [vmem:[%s1533_s0 + $0x52] sm:$0xff]  ;;  %v1043_v37 = vld [vmem:[%s1533_s0 + $0x62] sm:$0xff] }
  0x11   :  { %v714_v58 = vadd.f32 %v682_v27, %v618_v51  ;;  %v522_v5 = vadd.f32 %v490_v40, %v426_v59  ;;  %v235_v10 = vadd.f32 %v203_v62, %v139_v1  ;;  %v301_v12 = vmul.f32 0.12384141, %v977_v54  ;;  %v980_v42 = vld [vmem:[%s1533_s0 + $0x68] sm:$0xff]  ;;  %v981_v60 = vld [vmem:[%s1533_s0 + $0x78] sm:$0xff] }
  0x12   :  { %v620_v14 = vadd.f32 %v588_v63, %v523_v6  ;;  %v780_v15 = vmul.f32 0.07511361, %v1041_v0  ;;  %v397_v16 = vmul.f32 0.20417996, %v1009_v61  ;;  %v492_v18 = vmul.f32 0.12384141, %v1040_v44 }
  0x13   :  { %v810_v4 = vadd.f32 %v778_v38, %v714_v58  ;;  %v619_v13 = vadd.f32 %v587_v47, %v522_v5  ;;  %v332_v17 = vadd.f32 %v300_v2, %v235_v10  ;;  %v333_v20 = vadd.f32 %v301_v12, %v236_v3  ;;  %v1012_v43 = vld [vmem:[%s1533_s0 + $0x69] sm:$0xff]  ;;  %v1013_v5 = vld [vmem:[%s1533_s0 + $0x79] sm:$0xff] }
  0x14   :  { %v493_v21 = vmul.f32 0.12384141, %v1041_v0  ;;  %v716_v24 = vadd.f32 %v684_v9, %v620_v14  ;;  %v589_v25 = vmul.f32 0.07511361, %v978_v7  ;;  %v237_v26 = vadd.f32 %v779_v56, %v141_v8  ;;  %v1044_v59 = vld [vmem:[%s1533_s0 + $0x6a] sm:$0xff]  ;;  %v1045_v6 = vld [vmem:[%s1533_s0 + $0x7a] sm:$0xff] }
  0x15   :  { %843 = vst.msk [vmem:[%s1534_s1] sm:$0xff] %vm842_vm0, %v810_v4  ;;  %v715_v23 = vadd.f32 %v683_v48, %v619_v13  ;;  %v428_v27 = vadd.f32 %v396_v11, %v332_v17  ;;  %v429_v29 = vadd.f32 %v397_v16, %v333_v20  ;;  %v302_v31 = vmul.f32 0.12384141, %v978_v7  ;;  %v982_v8 = vld [vmem:[%s1533_s0 + $0x80] sm:$0xff] }
  0x16   :  { %v398_v32 = vmul.f32 0.20417996, %v1010_v19  ;;  %v812_v34 = vadd.f32 %v780_v15, %v716_v24  ;;  %v685_v35 = vmul.f32 0.12384141, %v1010_v19  ;;  %v590_v36 = vmul.f32 0.07511361, %v979_v22 }
  0x17   :  { %v811_v33 = vadd.f32 %v779_v56, %v715_v23  ;;  %v524_v38 = vadd.f32 %v492_v18, %v428_v27  ;;  %v525_v39 = vadd.f32 %v493_v21, %v429_v29  ;;  %v334_v40 = vadd.f32 %v302_v31, %v237_v26  ;;  %v1046_v16 = vld [vmem:[%s1533_s0 + $0x82] sm:$0xff]  ;;  %v983_v27 = vld [vmem:[%s1533_s0 + $0x90] sm:$0xff] }
  0x18   :  { %v494_v41 = vmul.f32 0.12384141, %v1042_v28  ;;  %845 = vst.msk [vmem:[%s1534_s1 + $0x10] sm:$0xff] %vm842_vm0, %v812_v34  ;;  %v781_v44 = vmul.f32 0.07511361, %v1042_v28  ;;  %v142_v46 = vadd.f32 %v684_v9, %v588_v63  ;;  %v143_v61 = vadd.f32 %v685_v35, %v589_v25 }
  0x19   :  { %844 = vst.msk [vmem:[%s1534_s1 + $0x8] sm:$0xff] %vm842_vm0, %v811_v33  ;;  %v686_v45 = vmul.f32 0.12384141, %v1011_v30  ;;  %v303_v47 = vmul.f32 0.12384141, %v979_v22  ;;  %v621_v48 = vadd.f32 %v589_v25, %v524_v38  ;;  %v622_v49 = vadd.f32 %v590_v36, %v525_v39 }
  0x1a   :  { %v782_v50 = vmul.f32 0.07511361, %v1043_v37  ;;  %v430_v51 = vadd.f32 %v398_v32, %v334_v40  ;;  %v591_v52 = vmul.f32 0.07511361, %v980_v42  ;;  %v687_v53 = vmul.f32 0.12384141, %v1012_v43 }
  0x1b   :  { %v238_v54 = vadd.f32 %v780_v15, %v142_v46  ;;  %v399_v55 = vmul.f32 0.20417996, %v1011_v30  ;;  %v717_v56 = vadd.f32 %v685_v35, %v621_v48  ;;  %v718_v57 = vadd.f32 %v686_v45, %v622_v49  ;;  %v1014_v15 = vld [vmem:[%s1533_s0 + $0x81] sm:$0xff]  ;;  %v1015_v30 = vld [vmem:[%s1533_s0 + $0x91] sm:$0xff] }
  0x1c   :  { %v526_v58 = vadd.f32 %v494_v41, %v430_v51  ;;  %v495_v63 = vmul.f32 0.12384141, %v1043_v37  ;;  %v304_v0 = vmul.f32 0.12384141, %v980_v42  ;;  %v400_v1 = vmul.f32 0.20417996, %v1012_v43 }
  0x1d   :  { %v335_v62 = vadd.f32 %v303_v47, %v238_v54  ;;  %v813_v2 = vadd.f32 %v781_v44, %v717_v56  ;;  %v814_v3 = vadd.f32 %v782_v50, %v718_v57  ;;  %v239_v7 = vadd.f32 %v781_v44, %v143_v61  ;;  %v1047_v44 = vld [vmem:[%s1533_s0 + $0x92] sm:$0xff]  ;;  %v1048_v54 = vld [vmem:[%s1533_s0 + $0x9a] sm:$0xff] }
  0x1e   :  { %v623_v4 = vadd.f32 %v591_v52, %v526_v58  ;;  %v783_v9 = vmul.f32 0.07511361, %v1044_v59  ;;  %v592_v11 = vmul.f32 0.07511361, %v981_v60  ;;  %v496_v12 = vmul.f32 0.12384141, %v1044_v59 }
  0x1f   :  { %v431_v10 = vadd.f32 %v399_v55, %v335_v62  ;;  %846 = vst.msk [vmem:[%s1534_s1 + $0x18] sm:$0xff] %vm842_vm0, %v813_v2  ;;  %847 = vst.msk [vmem:[%s1534_s1 + $0x20] sm:$0xff] %vm842_vm0, %v814_v3  ;;  %v336_v14 = vadd.f32 %v304_v0, %v239_v7  ;;  %v144_v17 = vadd.f32 %v686_v45, %v590_v36  ;;  %v305_v18 = vmul.f32 0.12384141, %v981_v60  ;;  %v984_v45 = vld [vmem:[%s1533_s0 + $0x98] sm:$0xff]  ;;  %v985_v0 = vld [vmem:[%s1533_s0 + $0xa8] sm:$0xff] }
  0x20   :  { %v719_v13 = vadd.f32 %v687_v53, %v623_v4  ;;  %v688_v20 = vmul.f32 0.12384141, %v1013_v5  ;;  %v784_v21 = vmul.f32 0.07511361, %v1045_v6  ;;  %v593_v22 = vmul.f32 0.07511361, %v982_v8 }
  0x21   :  { %v527_v19 = vadd.f32 %v495_v63, %v431_v10  ;;  %v432_v24 = vadd.f32 %v400_v1, %v336_v14  ;;  %v240_v25 = vadd.f32 %v782_v50, %v144_v17  ;;  %v401_v26 = vmul.f32 0.20417996, %v1013_v5 }
  0x22   :  { %v815_v23 = vadd.f32 %v783_v9, %v719_v13  ;;  %v689_v29 = vmul.f32 0.12384141, %v1014_v15  ;;  %v145_v31 = vadd.f32 %v687_v53, %v591_v52  ;;  %v306_v32 = vmul.f32 0.12384141, %v982_v8  ;;  %v1016_v53 = vld [vmem:[%s1533_s0 + $0x99] sm:$0xff]  ;;  %v1017_v8 = vld [vmem:[%s1533_s0 + $0xa9] sm:$0xff] }
  0x23   :  { %v624_v28 = vadd.f32 %v592_v11, %v527_v19  ;;  %v528_v33 = vadd.f32 %v496_v12, %v432_v24  ;;  %v785_v34 = vmul.f32 0.07511361, %v1046_v16  ;;  %v337_v35 = vadd.f32 %v305_v18, %v240_v25  ;;  %v1049_v13 = vld [vmem:[%s1533_s0 + $0xaa] sm:$0xff] }
  0x24   :  { %848 = vst.msk [vmem:[%s1534_s1 + $0x28] sm:$0xff] %vm842_vm0, %v815_v23  ;;  %v497_v36 = vmul.f32 0.12384141, %v1045_v6  ;;  %v594_v38 = vmul.f32 0.07511361, %v983_v27  ;;  %v241_v39 = vadd.f32 %v783_v9, %v145_v31  ;;  %v146_v46 = vadd.f32 %v688_v20, %v592_v11  ;;  %v1018_v23 = vld [vmem:[%s1533_s0 + $0xb1] sm:$0xff] }
  0x25   :  { %v720_v37 = vadd.f32 %v688_v20, %v624_v28  ;;  %v402_v40 = vmul.f32 0.20417996, %v1014_v15  ;;  %v625_v41 = vadd.f32 %v593_v22, %v528_v33  ;;  %v433_v42 = vadd.f32 %v401_v26, %v337_v35  ;;  %v986_v15 = vld [vmem:[%s1533_s0 + $0xb0] sm:$0xff] }
  0x26   :  { %v690_v43 = vmul.f32 0.12384141, %v1015_v30  ;;  %v338_v48 = vadd.f32 %v306_v32, %v241_v39  ;;  %v498_v49 = vmul.f32 0.12384141, %v1046_v16  ;;  %v307_v50 = vmul.f32 0.12384141, %v983_v27 }
  0x27   :  { %v816_v47 = vadd.f32 %v784_v21, %v720_v37  ;;  %v721_v51 = vadd.f32 %v689_v29, %v625_v41  ;;  %v529_v52 = vadd.f32 %v497_v36, %v433_v42  ;;  %v242_v55 = vadd.f32 %v784_v21, %v146_v46  ;;  %v1019_v39 = vld [vmem:[%s1533_s0 + $0xc1] sm:$0xff] }
  0x28   :  { %v403_v56 = vmul.f32 0.20417996, %v1015_v30  ;;  %v786_v57 = vmul.f32 0.07511361, %v1047_v44  ;;  %v434_v58 = vadd.f32 %v402_v40, %v338_v48  ;;  %v595_v59 = vmul.f32 0.07511361, %v984_v45 }
  0x29   :  { %849 = vst.msk [vmem:[%s1534_s1 + $0x30] sm:$0xff] %vm842_vm0, %v816_v47  ;;  %v499_v60 = vmul.f32 0.12384141, %v1047_v44  ;;  %v817_v61 = vadd.f32 %v785_v34, %v721_v51  ;;  %v626_v62 = vadd.f32 %v594_v38, %v529_v52  ;;  %v339_v63 = vadd.f32 %v307_v50, %v242_v55  ;;  %v1050_v30 = vld [vmem:[%s1533_s0 + $0xb2] sm:$0xff]  ;;  %v988_v46 = vld [vmem:[%s1533_s0 + $0xc8] sm:$0xff] }
  0x2a   :  { %v147_v1 = vadd.f32 %v689_v29, %v593_v22  ;;  %v530_v2 = vadd.f32 %v498_v49, %v434_v58  ;;  %v691_v3 = vmul.f32 0.12384141, %v1016_v53  ;;  %v787_v4 = vmul.f32 0.07511361, %v1048_v54 }
  0x2b   :  { %v308_v5 = vmul.f32 0.12384141, %v984_v45  ;;  %850 = vst.msk [vmem:[%s1534_s1 + $0x38] sm:$0xff] %vm842_vm0, %v817_v61  ;;  %v722_v6 = vadd.f32 %v690_v43, %v626_v62  ;;  %v435_v7 = vadd.f32 %v403_v56, %v339_v63  ;;  %v404_v10 = vmul.f32 0.20417996, %v1016_v53  ;;  %v1020_v53 = vld [vmem:[%s1533_s0 + $0xc9] sm:$0xff] }
  0x2c   :  { %v243_v9 = vadd.f32 %v785_v34, %v147_v1  ;;  %v627_v11 = vadd.f32 %v595_v59, %v530_v2  ;;  %v596_v12 = vmul.f32 0.07511361, %v985_v0  ;;  %v500_v14 = vmul.f32 0.12384141, %v1048_v54  ;;  %v987_v34 = vld [vmem:[%s1533_s0 + $0xc0] sm:$0xff]  ;;  %v1052_v62 = vld [vmem:[%s1533_s0 + $0xca] sm:$0xff] }
  0x2d   :  { %v148_v16 = vadd.f32 %v690_v43, %v594_v38  ;;  %v818_v17 = vadd.f32 %v786_v57, %v722_v6  ;;  %v531_v18 = vadd.f32 %v499_v60, %v435_v7  ;;  %v309_v20 = vmul.f32 0.12384141, %v985_v0  ;;  %v1051_v43 = vld [vmem:[%s1533_s0 + $0xc2] sm:$0xff]  ;;  %v989_v1 = vld [vmem:[%s1533_s0 + $0xd8] sm:$0xff] }
  0x2e   :  { %v340_v19 = vadd.f32 %v308_v5, %v243_v9  ;;  %v723_v21 = vadd.f32 %v691_v3, %v627_v11  ;;  %v692_v22 = vmul.f32 0.12384141, %v1017_v8  ;;  %v405_v25 = vmul.f32 0.20417996, %v1017_v8  ;;  %v1053_v11 = vld [vmem:[%s1533_s0 + $0xda] sm:$0xff] }
  0x2f   :  { %v244_v24 = vadd.f32 %v786_v57, %v148_v16  ;;  %851 = vst.msk [vmem:[%s1534_s1 + $0x40] sm:$0xff] %vm842_vm0, %v818_v17  ;;  %v628_v26 = vadd.f32 %v596_v12, %v531_v18  ;;  %v788_v27 = vmul.f32 0.07511361, %v1049_v13  ;;  %v597_v29 = vmul.f32 0.07511361, %v986_v15 }
  0x30   :  { %v436_v28 = vadd.f32 %v404_v10, %v340_v19  ;;  %v819_v31 = vadd.f32 %v787_v4, %v723_v21  ;;  %v501_v33 = vmul.f32 0.12384141, %v1049_v13  ;;  %v149_v35 = vadd.f32 %v691_v3, %v595_v59  ;;  %v1022_v21 = vld [vmem:[%s1533_s0 + $0xe1] sm:$0xff] }
  0x31   :  { %v341_v32 = vadd.f32 %v309_v20, %v244_v24  ;;  %v724_v36 = vadd.f32 %v692_v22, %v628_v26  ;;  %v693_v38 = vmul.f32 0.12384141, %v1018_v23  ;;  %v310_v40 = vmul.f32 0.12384141, %v986_v15 }
  0x32   :  { %v532_v37 = vadd.f32 %v500_v14, %v436_v28  ;;  %852 = vst.msk [vmem:[%s1534_s1 + $0x48] sm:$0xff] %vm842_vm0, %v819_v31  ;;  %v789_v41 = vmul.f32 0.07511361, %v1050_v30  ;;  %v245_v44 = vadd.f32 %v787_v4, %v149_v35  ;;  %v406_v45 = vmul.f32 0.20417996, %v1018_v23  ;;  %v1021_v4 = vld [vmem:[%s1533_s0 + $0xd9] sm:$0xff] }
  0x33   :  { %v437_v42 = vadd.f32 %v405_v25, %v341_v32  ;;  %v820_v47 = vadd.f32 %v788_v27, %v724_v36  ;;  %v598_v49 = vmul.f32 0.07511361, %v987_v34  ;;  %v502_v50 = vmul.f32 0.12384141, %v1050_v30  ;;  %v1054_v30 = vld [vmem:[%s1533_s0 + $0xe2] sm:$0xff]  ;;  %v991_v35 = vld [vmem:[%s1533_s0 + $0xf0] sm:$0xff] }
  0x34   :  { %v629_v48 = vadd.f32 %v597_v29, %v532_v37  ;;  %v342_v52 = vadd.f32 %v310_v40, %v245_v44  ;;  %v150_v54 = vadd.f32 %v692_v22, %v596_v12  ;;  %v311_v55 = vmul.f32 0.12384141, %v987_v34  ;;  %v990_v12 = vld [vmem:[%s1533_s0 + $0xe0] sm:$0xff] }
  0x35   :  { %v533_v51 = vadd.f32 %v501_v33, %v437_v42  ;;  %853 = vst.msk [vmem:[%s1534_s1 + $0x50] sm:$0xff] %vm842_vm0, %v820_v47  ;;  %v694_v57 = vmul.f32 0.12384141, %v1019_v39  ;;  %v790_v58 = vmul.f32 0.07511361, %v1051_v43  ;;  %v151_v5 = vadd.f32 %v693_v38, %v597_v29 }
  0x36   :  { %v725_v56 = vadd.f32 %v693_v38, %v629_v48  ;;  %v599_v59 = vmul.f32 0.07511361, %v988_v46  ;;  %v438_v61 = vadd.f32 %v406_v45, %v342_v52  ;;  %v246_v63 = vadd.f32 %v788_v27, %v150_v54  ;;  %v1023_v38 = vld [vmem:[%s1533_s0 + $0xf1] sm:$0xff] }
  0x37   :  { %v630_v60 = vadd.f32 %v598_v49, %v533_v51  ;;  %v407_v0 = vmul.f32 0.20417996, %v1019_v39  ;;  %v695_v3 = vmul.f32 0.12384141, %v1020_v53  ;;  %v312_v6 = vmul.f32 0.12384141, %v988_v46 }
  0x38   :  { %v821_v2 = vadd.f32 %v789_v41, %v725_v56  ;;  %v534_v8 = vadd.f32 %v502_v50, %v438_v61  ;;  %v343_v9 = vadd.f32 %v311_v55, %v246_v63  ;;  %v503_v10 = vmul.f32 0.12384141, %v1051_v43  ;;  %v1055_v52 = vld [vmem:[%s1533_s0 + $0xf2] sm:$0xff] }
  0x39   :  { %v726_v7 = vadd.f32 %v694_v57, %v630_v60  ;;  %v791_v13 = vmul.f32 0.07511361, %v1052_v62  ;;  %v600_v14 = vmul.f32 0.07511361, %v989_v1  ;;  %v247_v15 = vadd.f32 %v789_v41, %v151_v5  ;;  %v1024_v61 = vld [vmem:[%s1533_s0 + $0xf9] sm:$0xff] }
  0x3a   :  { %854 = vst.msk [vmem:[%s1534_s1 + $0x58] sm:$0xff] %vm842_vm0, %v821_v2  ;;  %v408_v16 = vmul.f32 0.20417996, %v1020_v53  ;;  %v631_v18 = vadd.f32 %v599_v59, %v534_v8  ;;  %v439_v19 = vadd.f32 %v407_v0, %v343_v9  ;;  %v696_v20 = vmul.f32 0.12384141, %v1021_v4  ;;  %v992_v53 = vld [vmem:[%s1533_s0 + $0xf8] sm:$0xff] }
  0x3b   :  { %v822_v17 = vadd.f32 %v790_v58, %v726_v7  ;;  %v344_v22 = vadd.f32 %v312_v6, %v247_v15  ;;  %v504_v23 = vmul.f32 0.12384141, %v1052_v62  ;;  %v152_v24 = vadd.f32 %v694_v57, %v598_v49  ;;  %v1056_v62 = vld [vmem:[%s1533_s0 + $0xfa] sm:$0xff]  ;;  %v993_v8 = vld [vmem:[%s1533_s0 + $0x108] sm:$0xff] }
  0x3c   :  { %v313_v25 = vmul.f32 0.12384141, %v989_v1  ;;  %v727_v26 = vadd.f32 %v695_v3, %v631_v18  ;;  %v535_v27 = vadd.f32 %v503_v10, %v439_v19  ;;  %v792_v28 = vmul.f32 0.07511361, %v1053_v11 }
  0x3d   :  { %855 = vst.msk [vmem:[%s1534_s1 + $0x60] sm:$0xff] %vm842_vm0, %v822_v17  ;;  %v601_v29 = vmul.f32 0.07511361, %v990_v12  ;;  %v440_v31 = vadd.f32 %v408_v16, %v344_v22  ;;  %v697_v32 = vmul.f32 0.12384141, %v1022_v21  ;;  %v248_v33 = vadd.f32 %v790_v58, %v152_v24  ;;  %v1025_v16 = vld [vmem:[%s1533_s0 + $0x109] sm:$0xff] }
  0x3e   :  { %v409_v34 = vmul.f32 0.20417996, %v1021_v4  ;;  %v823_v36 = vadd.f32 %v791_v13, %v727_v26  ;;  %v632_v37 = vadd.f32 %v600_v14, %v535_v27  ;;  %v153_v39 = vadd.f32 %v695_v3, %v599_v59 }
  0x3f   :  { %v314_v40 = vmul.f32 0.12384141, %v990_v12  ;;  %v536_v41 = vadd.f32 %v504_v23, %v440_v31  ;;  %v793_v42 = vmul.f32 0.07511361, %v1054_v30  ;;  %v345_v43 = vadd.f32 %v313_v25, %v248_v33  ;;  %v994_v23 = vld [vmem:[%s1533_s0 + $0x110] sm:$0xff] }
  0x40   :  { %v505_v44 = vmul.f32 0.12384141, %v1053_v11  ;;  %856 = vst.msk [vmem:[%s1534_s1 + $0x68] sm:$0xff] %vm842_vm0, %v823_v36  ;;  %v728_v45 = vadd.f32 %v696_v20, %v632_v37  ;;  %v602_v46 = vmul.f32 0.07511361, %v991_v35  ;;  %v249_v47 = vadd.f32 %v791_v13, %v153_v39  ;;  %v1026_v31 = vld [vmem:[%s1533_s0 + $0x111] sm:$0xff] }
  0x41   :  { %v410_v48 = vmul.f32 0.20417996, %v1022_v21  ;;  %v633_v49 = vadd.f32 %v601_v29, %v536_v41  ;;  %v441_v50 = vadd.f32 %v409_v34, %v345_v43  ;;  %v698_v51 = vmul.f32 0.12384141, %v1023_v38  ;;  %v1057_v21 = vld [vmem:[%s1533_s0 + $0x10a] sm:$0xff] }
  0x42   :  { %v154_v54 = vadd.f32 %v696_v20, %v600_v14  ;;  %v824_v55 = vadd.f32 %v792_v28, %v728_v45  ;;  %v346_v56 = vadd.f32 %v314_v40, %v249_v47  ;;  %v506_v57 = vmul.f32 0.12384141, %v1054_v30  ;;  %v1027_v47 = vld [vmem:[%s1533_s0 + $0x121] sm:$0xff] }
  0x43   :  { %v315_v58 = vmul.f32 0.12384141, %v991_v35  ;;  %v729_v59 = vadd.f32 %v697_v32, %v633_v49  ;;  %v537_v60 = vadd.f32 %v505_v44, %v441_v50  ;;  %v411_v0 = vmul.f32 0.20417996, %v1023_v38  ;;  %v1058_v38 = vld [vmem:[%s1533_s0 + $0x112] sm:$0xff] }
  0x44   :  { %v250_v63 = vadd.f32 %v792_v28, %v154_v54  ;;  %857 = vst.msk [vmem:[%s1534_s1 + $0x70] sm:$0xff] %vm842_vm0, %v824_v55  ;;  %v794_v1 = vmul.f32 0.07511361, %v1055_v52  ;;  %v442_v2 = vadd.f32 %v410_v48, %v346_v56  ;;  %v603_v3 = vmul.f32 0.07511361, %v992_v53  ;;  %v996_v54 = vld [vmem:[%s1533_s0 + $0x128] sm:$0xff] }
  0x45   :  { %v507_v4 = vmul.f32 0.12384141, %v1055_v52  ;;  %v825_v5 = vadd.f32 %v793_v42, %v729_v59  ;;  %v634_v6 = vadd.f32 %v602_v46, %v537_v60  ;;  %v155_v9 = vadd.f32 %v697_v32, %v601_v29 }
  0x46   :  { %v347_v7 = vadd.f32 %v315_v58, %v250_v63  ;;  %v538_v10 = vadd.f32 %v506_v57, %v442_v2  ;;  %v699_v11 = vmul.f32 0.12384141, %v1024_v61  ;;  %v795_v12 = vmul.f32 0.07511361, %v1056_v62 }
  0x47   :  { %v316_v13 = vmul.f32 0.12384141, %v992_v53  ;;  %858 = vst.msk [vmem:[%s1534_s1 + $0x78] sm:$0xff] %vm842_vm0, %v825_v5  ;;  %v730_v14 = vadd.f32 %v698_v51, %v634_v6  ;;  %v251_v17 = vadd.f32 %v793_v42, %v155_v9  ;;  %v412_v18 = vmul.f32 0.20417996, %v1024_v61  ;;  %v995_v42 = vld [vmem:[%s1533_s0 + $0x120] sm:$0xff] }
  0x48   :  { %v443_v15 = vadd.f32 %v411_v0, %v347_v7  ;;  %v635_v19 = vadd.f32 %v603_v3, %v538_v10  ;;  %v604_v20 = vmul.f32 0.07511361, %v993_v8  ;;  %v508_v22 = vmul.f32 0.12384141, %v1056_v62  ;;  %v1028_v61 = vld [vmem:[%s1533_s0 + $0x129] sm:$0xff]  ;;  %v997_v9 = vld [vmem:[%s1533_s0 + $0x138] sm:$0xff] }
  0x49   :  { %v156_v24 = vadd.f32 %v698_v51, %v602_v46  ;;  %v826_v25 = vadd.f32 %v794_v1, %v730_v14  ;;  %v348_v27 = vadd.f32 %v316_v13, %v251_v17  ;;  %v317_v28 = vmul.f32 0.12384141, %v993_v8  ;;  %v1059_v51 = vld [vmem:[%s1533_s0 + $0x122] sm:$0xff]  ;;  %v1060_v6 = vld [vmem:[%s1533_s0 + $0x12a] sm:$0xff] }
  0x4a   :  { %v539_v26 = vadd.f32 %v507_v4, %v443_v15  ;;  %v731_v29 = vadd.f32 %v699_v11, %v635_v19  ;;  %v700_v30 = vmul.f32 0.12384141, %v1025_v16  ;;  %v413_v33 = vmul.f32 0.20417996, %v1025_v16  ;;  %v1061_v19 = vld [vmem:[%s1533_s0 + $0x13a] sm:$0xff] }
  0x4b   :  { %v252_v32 = vadd.f32 %v794_v1, %v156_v24  ;;  %859 = vst.msk [vmem:[%s1534_s1 + $0x80] sm:$0xff] %vm842_vm0, %v826_v25  ;;  %v796_v35 = vmul.f32 0.07511361, %v1057_v21  ;;  %v444_v36 = vadd.f32 %v412_v18, %v348_v27  ;;  %v605_v37 = vmul.f32 0.07511361, %v994_v23 }
  0x4c   :  { %v636_v34 = vadd.f32 %v604_v20, %v539_v26  ;;  %v827_v39 = vadd.f32 %v795_v12, %v731_v29  ;;  %v509_v41 = vmul.f32 0.12384141, %v1057_v21  ;;  %v157_v43 = vadd.f32 %v699_v11, %v603_v3  ;;  %v1030_v29 = vld [vmem:[%s1533_s0 + $0x141] sm:$0xff] }
  0x4d   :  { %v349_v40 = vadd.f32 %v317_v28, %v252_v32  ;;  %v540_v45 = vadd.f32 %v508_v22, %v444_v36  ;;  %v701_v46 = vmul.f32 0.12384141, %v1026_v31  ;;  %v318_v48 = vmul.f32 0.12384141, %v994_v23 }
  0x4e   :  { %v732_v44 = vadd.f32 %v700_v30, %v636_v34  ;;  %860 = vst.msk [vmem:[%s1534_s1 + $0x88] sm:$0xff] %vm842_vm0, %v827_v39  ;;  %v797_v49 = vmul.f32 0.07511361, %v1058_v38  ;;  %v253_v52 = vadd.f32 %v795_v12, %v157_v43  ;;  %v414_v53 = vmul.f32 0.20417996, %v1026_v31  ;;  %v1029_v12 = vld [vmem:[%s1533_s0 + $0x139] sm:$0xff] }
  0x4f   :  { %v445_v50 = vadd.f32 %v413_v33, %v349_v40  ;;  %v637_v56 = vadd.f32 %v605_v37, %v540_v45  ;;  %v606_v57 = vmul.f32 0.07511361, %v995_v42  ;;  %v510_v58 = vmul.f32 0.12384141, %v1058_v38  ;;  %v1062_v38 = vld [vmem:[%s1533_s0 + $0x142] sm:$0xff]  ;;  %v999_v43 = vld [vmem:[%s1533_s0 + $0x150] sm:$0xff] }
  0x50   :  { %v828_v55 = vadd.f32 %v796_v35, %v732_v44  ;;  %v350_v60 = vadd.f32 %v318_v48, %v253_v52  ;;  %v158_v62 = vadd.f32 %v700_v30, %v604_v20  ;;  %v319_v63 = vmul.f32 0.12384141, %v995_v42  ;;  %v998_v20 = vld [vmem:[%s1533_s0 + $0x140] sm:$0xff] }
  0x51   :  { %v541_v59 = vadd.f32 %v509_v41, %v445_v50  ;;  %v733_v0 = vadd.f32 %v701_v46, %v637_v56  ;;  %v702_v1 = vmul.f32 0.12384141, %v1027_v47  ;;  %v798_v2 = vmul.f32 0.07511361, %v1059_v51 }
  0x52   :  { %861 = vst.msk [vmem:[%s1534_s1 + $0x90] sm:$0xff] %vm842_vm0, %v828_v55  ;;  %v607_v3 = vmul.f32 0.07511361, %v996_v54  ;;  %v446_v5 = vadd.f32 %v414_v53, %v350_v60  ;;  %v254_v7 = vadd.f32 %v796_v35, %v158_v62  ;;  %v415_v8 = vmul.f32 0.20417996, %v1027_v47  ;;  %v1063_v60 = vld [vmem:[%s1533_s0 + $0x152] sm:$0xff] }
  0x53   :  { %v638_v4 = vadd.f32 %v606_v57, %v541_v59  ;;  %v829_v10 = vadd.f32 %v797_v49, %v733_v0  ;;  %v703_v11 = vmul.f32 0.12384141, %v1028_v61  ;;  %v159_v13 = vadd.f32 %v701_v46, %v605_v37  ;;  %v1031_v46 = vld [vmem:[%s1533_s0 + $0x151] sm:$0xff] }
  0x54   :  { %v320_v14 = vmul.f32 0.12384141, %v996_v54  ;;  %v542_v16 = vadd.f32 %v510_v58, %v446_v5  ;;  %v351_v17 = vadd.f32 %v319_v63, %v254_v7  ;;  %v511_v18 = vmul.f32 0.12384141, %v1059_v51  ;;  %v1032_v5 = vld [vmem:[%s1533_s0 + $0x159] sm:$0xff] }
  0x55   :  { %v734_v15 = vadd.f32 %v702_v1, %v638_v4  ;;  %862 = vst.msk [vmem:[%s1534_s1 + $0x98] sm:$0xff] %vm842_vm0, %v829_v10  ;;  %v799_v21 = vmul.f32 0.07511361, %v1060_v6  ;;  %v608_v22 = vmul.f32 0.07511361, %v997_v9  ;;  %v255_v23 = vadd.f32 %v797_v49, %v159_v13 }
  0x56   :  { %v416_v24 = vmul.f32 0.20417996, %v1028_v61  ;;  %v639_v26 = vadd.f32 %v607_v3, %v542_v16  ;;  %v447_v27 = vadd.f32 %v415_v8, %v351_v17  ;;  %v704_v28 = vmul.f32 0.12384141, %v1029_v12  ;;  %v1000_v61 = vld [vmem:[%s1533_s0 + $0x158] sm:$0xff]  ;;  %v1001_v16 = vld [vmem:[%s1533_s0 + $0x168] sm:$0xff] }
  0x57   :  { %v830_v25 = vadd.f32 %v798_v2, %v734_v15  ;;  %v352_v30 = vadd.f32 %v320_v14, %v255_v23  ;;  %v512_v31 = vmul.f32 0.12384141, %v1060_v6  ;;  %v160_v32 = vadd.f32 %v702_v1, %v606_v57  ;;  %v1064_v6 = vld [vmem:[%s1533_s0 + $0x15a] sm:$0xff] }
  0x58   :  { %v321_v33 = vmul.f32 0.12384141, %v997_v9  ;;  %v735_v34 = vadd.f32 %v703_v11, %v639_v26  ;;  %v543_v35 = vadd.f32 %v511_v18, %v447_v27  ;;  %v800_v36 = vmul.f32 0.07511361, %v1061_v19 }
  0x59   :  { %863 = vst.msk [vmem:[%s1534_s1 + $0xa0] sm:$0xff] %vm842_vm0, %v830_v25  ;;  %v609_v37 = vmul.f32 0.07511361, %v998_v20  ;;  %v448_v39 = vadd.f32 %v416_v24, %v352_v30  ;;  %v705_v40 = vmul.f32 0.12384141, %v1030_v29  ;;  %v256_v41 = vadd.f32 %v798_v2, %v160_v32  ;;  %v1033_v24 = vld [vmem:[%s1533_s0 + $0x169] sm:$0xff] }
  0x5a   :  { %v417_v42 = vmul.f32 0.20417996, %v1029_v12  ;;  %v831_v44 = vadd.f32 %v799_v21, %v735_v34  ;;  %v640_v45 = vadd.f32 %v608_v22, %v543_v35  ;;  %v161_v47 = vadd.f32 %v703_v11, %v607_v3 }
  0x5b   :  { %v322_v48 = vmul.f32 0.12384141, %v998_v20  ;;  %v544_v49 = vadd.f32 %v512_v31, %v448_v39  ;;  %v801_v50 = vmul.f32 0.07511361, %v1062_v38  ;;  %v353_v51 = vadd.f32 %v321_v33, %v256_v41  ;;  %v1002_v31 = vld [vmem:[%s1533_s0 + $0x170] sm:$0xff] }
  0x5c   :  { %v513_v52 = vmul.f32 0.12384141, %v1061_v19  ;;  %864 = vst.msk [vmem:[%s1534_s1 + $0xa8] sm:$0xff] %vm842_vm0, %v831_v44  ;;  %v736_v53 = vadd.f32 %v704_v28, %v640_v45  ;;  %v610_v54 = vmul.f32 0.07511361, %v999_v43  ;;  %v257_v55 = vadd.f32 %v799_v21, %v161_v47  ;;  %v1034_v39 = vld [vmem:[%s1533_s0 + $0x171] sm:$0xff] }
  0x5d   :  { %v418_v56 = vmul.f32 0.20417996, %v1030_v29  ;;  %v641_v57 = vadd.f32 %v609_v37, %v544_v49  ;;  %v449_v58 = vadd.f32 %v417_v42, %v353_v51  ;;  %v706_v59 = vmul.f32 0.12384141, %v1031_v46  ;;  %v1065_v29 = vld [vmem:[%s1533_s0 + $0x16a] sm:$0xff] }
  0x5e   :  { %v162_v62 = vadd.f32 %v704_v28, %v608_v22  ;;  %v832_v63 = vadd.f32 %v800_v36, %v736_v53  ;;  %v354_v0 = vadd.f32 %v322_v48, %v257_v55  ;;  %v514_v1 = vmul.f32 0.12384141, %v1062_v38  ;;  %v1003_v53 = vld [vmem:[%s1533_s0 + $0x180] sm:$0xff]  ;;  %v1066_v55 = vld [vmem:[%s1533_s0 + $0x172] sm:$0xff] }
  0x5f   :  { %v323_v2 = vmul.f32 0.12384141, %v999_v43  ;;  %v737_v3 = vadd.f32 %v705_v40, %v641_v57  ;;  %v545_v4 = vadd.f32 %v513_v52, %v449_v58  ;;  %v419_v8 = vmul.f32 0.20417996, %v1031_v46  ;;  %v1035_v58 = vld [vmem:[%s1533_s0 + $0x181] sm:$0xff] }
  0x60   :  { %v258_v7 = vadd.f32 %v800_v36, %v162_v62  ;;  %865 = vst.msk [vmem:[%s1534_s1 + $0xb0] sm:$0xff] %vm842_vm0, %v832_v63  ;;  %v802_v9 = vmul.f32 0.07511361, %v1063_v60  ;;  %v450_v10 = vadd.f32 %v418_v56, %v354_v0  ;;  %v611_v11 = vmul.f32 0.07511361, %v1000_v61 }
  0x61   :  { %v515_v12 = vmul.f32 0.12384141, %v1063_v60  ;;  %v833_v13 = vadd.f32 %v801_v50, %v737_v3  ;;  %v642_v14 = vadd.f32 %v610_v54, %v545_v4  ;;  %v163_v17 = vadd.f32 %v705_v40, %v609_v37  ;;  %v1004_v4 = vld [vmem:[%s1533_s0 + $0x188] sm:$0xff] }
  0x62   :  { %v355_v15 = vadd.f32 %v323_v2, %v258_v7  ;;  %v546_v18 = vadd.f32 %v514_v1, %v450_v10  ;;  %v707_v19 = vmul.f32 0.12384141, %v1032_v5  ;;  %v803_v20 = vmul.f32 0.07511361, %v1064_v6  ;;  %v1067_v2 = vld [vmem:[%s1533_s0 + $0x182] sm:$0xff] }
  0x63   :  { %v324_v21 = vmul.f32 0.12384141, %v1000_v61  ;;  %866 = vst.msk [vmem:[%s1534_s1 + $0xb8] sm:$0xff] %vm842_vm0, %v833_v13  ;;  %v738_v22 = vadd.f32 %v706_v59, %v642_v14  ;;  %v259_v25 = vadd.f32 %v801_v50, %v163_v17  ;;  %v420_v26 = vmul.f32 0.20417996, %v1032_v5  ;;  %v1036_v13 = vld [vmem:[%s1533_s0 + $0x189] sm:$0xff] }
  0x64   :  { %v451_v23 = vadd.f32 %v419_v8, %v355_v15  ;;  %v643_v27 = vadd.f32 %v611_v11, %v546_v18  ;;  %v612_v28 = vmul.f32 0.07511361, %v1001_v16  ;;  %v516_v30 = vmul.f32 0.12384141, %v1064_v6  ;;  %v1005_v18 = vld [vmem:[%s1533_s0 + $0x198] sm:$0xff] }
  0x65   :  { %v164_v32 = vadd.f32 %v706_v59, %v610_v54  ;;  %v834_v33 = vadd.f32 %v802_v9, %v738_v22  ;;  %v356_v35 = vadd.f32 %v324_v21, %v259_v25  ;;  %v325_v36 = vmul.f32 0.12384141, %v1001_v16 }
  0x66   :  { %v547_v34 = vadd.f32 %v515_v12, %v451_v23  ;;  %v739_v37 = vadd.f32 %v707_v19, %v643_v27  ;;  %v708_v38 = vmul.f32 0.12384141, %v1033_v24  ;;  %v421_v41 = vmul.f32 0.20417996, %v1033_v24  ;;  %v1068_v23 = vld [vmem:[%s1533_s0 + $0x18a] sm:$0xff]  ;;  %v1037_v27 = vld [vmem:[%s1533_s0 + $0x199] sm:$0xff] }
  0x67   :  { %v260_v40 = vadd.f32 %v802_v9, %v164_v32  ;;  %867 = vst.msk [vmem:[%s1534_s1 + $0xc0] sm:$0xff] %vm842_vm0, %v834_v33  ;;  %v804_v43 = vmul.f32 0.07511361, %v1065_v29  ;;  %v452_v44 = vadd.f32 %v420_v26, %v356_v35  ;;  %v613_v45 = vmul.f32 0.07511361, %v1002_v31  ;;  %v1069_v35 = vld [vmem:[%s1533_s0 + $0x19a] sm:$0xff] }
  0x68   :  { %v644_v42 = vadd.f32 %v612_v28, %v547_v34  ;;  %v835_v46 = vadd.f32 %v803_v20, %v739_v37  ;;  %v517_v48 = vmul.f32 0.12384141, %v1065_v29  ;;  %v165_v49 = vadd.f32 %v707_v19, %v611_v11  ;;  %v1006_v34 = vld [vmem:[%s1533_s0 + $0x1a0] sm:$0xff] }
  0x69   :  { %v357_v47 = vadd.f32 %v325_v36, %v260_v40  ;;  %v548_v51 = vadd.f32 %v516_v30, %v452_v44  ;;  %v709_v52 = vmul.f32 0.12384141, %v1034_v39  ;;  %v326_v54 = vmul.f32 0.12384141, %v1002_v31 }
  0x6a   :  { %v740_v50 = vadd.f32 %v708_v38, %v644_v42  ;;  %868 = vst.msk [vmem:[%s1534_s1 + $0xc8] sm:$0xff] %vm842_vm0, %v835_v46  ;;  %v614_v57 = vmul.f32 0.07511361, %v1003_v53  ;;  %v261_v59 = vadd.f32 %v803_v20, %v165_v49  ;;  %v422_v60 = vmul.f32 0.20417996, %v1034_v39 }
  0x6b   :  { %v453_v56 = vadd.f32 %v421_v41, %v357_v47  ;;  %v645_v62 = vadd.f32 %v613_v45, %v548_v51  ;;  %v710_v63 = vmul.f32 0.12384141, %v1035_v58  ;;  %v518_v0 = vmul.f32 0.12384141, %v1066_v55  ;;  %v1038_v41 = vld [vmem:[%s1533_s0 + $0x1a1] sm:$0xff] }
  0x6c   :  { %v836_v61 = vadd.f32 %v804_v43, %v740_v50  ;;  %v358_v3 = vadd.f32 %v326_v54, %v261_v59  ;;  %v166_v5 = vadd.f32 %v708_v38, %v612_v28  ;;  %v327_v6 = vmul.f32 0.12384141, %v1003_v53  ;;  %v1070_v47 = vld [vmem:[%s1533_s0 + $0x1a2] sm:$0xff] }
  0x6d   :  { %v549_v1 = vadd.f32 %v517_v48, %v453_v56  ;;  %v741_v7 = vadd.f32 %v709_v52, %v645_v62  ;;  %v805_v8 = vmul.f32 0.07511361, %v1066_v55  ;;  %v806_v9 = vmul.f32 0.07511361, %v1067_v2 }
  0x6e   :  { %869 = vst.msk [vmem:[%s1534_s1 + $0xd0] sm:$0xff] %vm842_vm0, %v836_v61  ;;  %v615_v10 = vmul.f32 0.07511361, %v1004_v4  ;;  %v454_v12 = vadd.f32 %v422_v60, %v358_v3  ;;  %v262_v14 = vadd.f32 %v804_v43, %v166_v5  ;;  %v423_v15 = vmul.f32 0.20417996, %v1035_v58 }
  0x6f   :  { %v646_v11 = vadd.f32 %v614_v57, %v549_v1  ;;  %v837_v16 = vadd.f32 %v805_v8, %v741_v7  ;;  %v711_v17 = vmul.f32 0.12384141, %v1036_v13  ;;  %v167_v19 = vadd.f32 %v709_v52, %v613_v45 }
  0x70   :  { %v328_v20 = vmul.f32 0.12384141, %v1004_v4  ;;  %v550_v22 = vadd.f32 %v518_v0, %v454_v12  ;;  %v359_v24 = vadd.f32 %v327_v6, %v262_v14  ;;  %v519_v25 = vmul.f32 0.12384141, %v1067_v2 }
  0x71   :  { %v742_v21 = vadd.f32 %v710_v63, %v646_v11  ;;  %870 = vst.msk [vmem:[%s1534_s1 + $0xd8] sm:$0xff] %vm842_vm0, %v837_v16  ;;  %v807_v26 = vmul.f32 0.07511361, %v1068_v23  ;;  %v263_v28 = vadd.f32 %v805_v8, %v167_v19  ;;  %v424_v29 = vmul.f32 0.20417996, %v1036_v13 }
  0x72   :  { %v647_v31 = vadd.f32 %v615_v10, %v550_v22  ;;  %v455_v32 = vadd.f32 %v423_v15, %v359_v24  ;;  %v616_v33 = vmul.f32 0.07511361, %v1005_v18  ;;  %v520_v37 = vmul.f32 0.12384141, %v1068_v23 }
  0x73   :  { %v838_v30 = vadd.f32 %v806_v9, %v742_v21  ;;  %v360_v36 = vadd.f32 %v328_v20, %v263_v28  ;;  %v712_v40 = vmul.f32 0.12384141, %v1037_v27  ;;  %v617_v43 = vmul.f32 0.07511361, %v1006_v34 }
  0x74   :  { %v743_v38 = vadd.f32 %v711_v17, %v647_v31  ;;  %v551_v39 = vadd.f32 %v519_v25, %v455_v32  ;;  %v808_v46 = vmul.f32 0.07511361, %v1069_v35  ;;  %v713_v49 = vmul.f32 0.12384141, %v1038_v41 }
  0x75   :  { %871 = vst.msk [vmem:[%s1534_s1 + $0xe0] sm:$0xff] %vm842_vm0, %v838_v30  ;;  %v456_v42 = vadd.f32 %v424_v29, %v360_v36  ;;  %v809_v52 = vmul.f32 0.07511361, %v1070_v47 }
  0x76   :  { %v839_v44 = vadd.f32 %v807_v26, %v743_v38  ;;  %v648_v45 = vadd.f32 %v616_v33, %v551_v39 }
  0x77   :  { %v552_v48 = vadd.f32 %v520_v37, %v456_v42 }
  0x78   :  { %872 = vst.msk [vmem:[%s1534_s1 + $0xe8] sm:$0xff] %vm842_vm0, %v839_v44  ;;  %v744_v50 = vadd.f32 %v712_v40, %v648_v45 }
  0x79   :  { %v649_v51 = vadd.f32 %v617_v43, %v552_v48 }
  0x7a   :  { %v840_v53 = vadd.f32 %v808_v46, %v744_v50 }
  0x7b   :  { %v745_v54 = vadd.f32 %v713_v49, %v649_v51 }
  0x7c   :  { %873 = vst.msk [vmem:[%s1534_s1 + $0xf0] sm:$0xff] %vm842_vm0, %v840_v53 }
  0x7d   :  { %v841_v55 = vadd.f32 %v809_v52, %v745_v54 }
  0x7f   :  { %874 = vst.msk [vmem:[%s1534_s1 + $0xf8] sm:$0xff] %vm842_vm0, %v841_v55 }

</bundles_post_ra>
